<compile_context>
chip_gen: v7x
topology: tpu7x:2x2x1
jax: 0.10.0
libtpu: 0.0.40
codegen_flags: <defaults>
</compile_context>

<pallas_src>
import jax
import jax.numpy as jnp
from jax.experimental import pallas as pl
from jax.experimental.pallas import tpu as pltpu


def _round_up(x, m):
    return ((x + m - 1) // m) * m


def _ceil_div(a, b):
    return (a + b - 1) // b


def classifier_kernel(img_ref, txt_ref, w1i_ref, w1t_ref, b1_ref, w2_ref, b2_ref, out_ref):
    # In-kernel cast of the f32 activation tiles to bf16 MXU operands
    # (VPU cast; avoids a separate wrapper-side XLA cast pass over HBM).
    img = img_ref[...].astype(jnp.bfloat16)
    txt = txt_ref[...].astype(jnp.bfloat16)

    # fc: two bf16 MXU dots summed in a single f32 accumulator replaces
    # cat((img, text), 1) @ w1  (no lane-axis concat / layout copy).
    h = jnp.dot(img, w1i_ref[...], preferred_element_type=jnp.float32)
    h = h + jnp.dot(txt, w1t_ref[...], preferred_element_type=jnp.float32)
    h = h + b1_ref[...]          # bias in f32
    h = jnp.maximum(h, 0.0)      # ReLU in f32 (no bf16 VPU dependence)

    # TODO(synk): Dropout(p=0.2) is identity in eval mode; training-mode
    # masking (pltpu.prng_seed / prng_random_bits + 1/(1-p) scaling) omitted.

    # classifier: bf16 MXU dot, f32 accumulate + bias
    y = jnp.dot(h.astype(jnp.bfloat16), w2_ref[...], preferred_element_type=jnp.float32)
    y = y + b2_ref[...]
    out_ref[...] = y.astype(out_ref.dtype)


def prepare_classifier_params(w1, b1, w2, b2, projection_dim):
    """One-time weight prep (split fc weight, bf16 MXU operands, f32 biases).

    Call once at model init so it is not in the per-forward path.
    """
    P = projection_dim
    return dict(
        w1_img=w1[:P].astype(jnp.bfloat16),   # img half of fused fc weight
        w1_txt=w1[P:].astype(jnp.bfloat16),   # text half
        b1=b1.astype(jnp.float32),
        w2=w2.astype(jnp.bfloat16),
        b2=b2.astype(jnp.float32),
    )


def classifier_forward(text_f, img_f, params, *, row_tile=8192):
    """text_f, img_f: (B, P) f32.  params from prepare_classifier_params()."""
    B, P = text_f.shape
    H = params["w1_img"].shape[1]
    A = params["w2"].shape[1]
    del H  # (documented only)

    # Row tile: big enough to amortize the ~0.35 us per-step overhead, but
    # capped so large batches still see >= 2 grid steps (double-buffering,
    # and 2-TC sharding on v7x via the "parallel" axis).
    tm = min(row_tile, max(8, _round_up(_ceil_div(B, 2), 8)))
    grid = (_ceil_div(B, tm),)   # ragged last block is clipped by Pallas

    act_spec = pl.BlockSpec((tm, P), lambda i: (i, 0))
    const = lambda arr: pl.BlockSpec(arr.shape, lambda i: (0,) * arr.ndim)

    out = pl.pallas_call(
        classifier_kernel,
        out_shape=jax.ShapeDtypeStruct((B, A), jnp.float32),
        grid=grid,
        in_specs=[
            act_spec,                  # img_f tile (f32, cast in kernel)
            act_spec,                  # text_f tile (f32, cast in kernel)
            const(params["w1_img"]),   # (P, H) resident
            const(params["w1_txt"]),   # (P, H) resident
            const(params["b1"]),       # (1, H) resident
            const(params["w2"]),       # (H, A) resident
            const(params["b2"]),       # (1, A) resident
        ],
        out_specs=pl.BlockSpec((tm, A), lambda i: (i, 0)),
        compiler_params=pltpu.CompilerParams(
            dimension_semantics=("parallel",),
            vmem_limit_bytes=32 * 1024 * 1024,
        ),
    )(img_f, text_f, params["w1_img"], params["w1_txt"],
      params["b1"], params["w2"], params["b2"])

    return out


def reference_forward_bf16(text_f, img_f, w1, b1, w2, b2):
    """Reference with the same bf16 quantization of MXU operands."""
    x = jnp.concatenate([img_f, text_f], axis=1).astype(jnp.bfloat16)
    h = jnp.dot(x, w1.astype(jnp.bfloat16), preferred_element_type=jnp.float32) + b1
    h = jnp.maximum(h, 0.0)
    y = jnp.dot(h.astype(jnp.bfloat16), w2.astype(jnp.bfloat16),
                preferred_element_type=jnp.float32) + b2
    return y


def reference_forward_f32(text_f, img_f, w1, b1, w2, b2):
    x = jnp.concatenate([img_f, text_f], axis=1)
    h = jnp.maximum(x @ w1 + b1, 0.0)
    return h @ w2 + b2


if __name__ == "__main__":
    # Small shapes consistent with the module's forward:
    #   projection_dim P = 16  -> fc input = 2P = 32
    #   hidden_dim     H = 32
    #   answer_space   A = 16
    #   batch          B = 2
    B, P, H, A = 2, 16, 32, 16

    key = jax.random.PRNGKey(0)
    k_text, k_img, k_w1, k_b1, k_w2, k_b2 = jax.random.split(key, 6)

    text_f = jax.random.normal(k_text, (B, P), dtype=jnp.float32)
    img_f = jax.random.normal(k_img, (B, P), dtype=jnp.float32)

    # PyTorch-Linear-style uniform init, stored transposed as (in, out).
    bound1 = 1.0 / jnp.sqrt(2.0 * P)
    w1 = jax.random.uniform(k_w1, (2 * P, H), jnp.float32, -bound1, bound1)
    b1 = jax.random.uniform(k_b1, (1, H), jnp.float32, -bound1, bound1)
    bound2 = 1.0 / jnp.sqrt(float(H))
    w2 = jax.random.uniform(k_w2, (H, A), jnp.float32, -bound2, bound2)
    b2 = jax.random.uniform(k_b2, (1, A), jnp.float32, -bound2, bound2)

    # One-time weight prep (outside the per-forward path).
    params = prepare_classifier_params(w1, b1, w2, b2, P)

    out = classifier_forward(text_f, img_f, params)
    out = jax.block_until_ready(out)
    assert out.shape == (B, A)

    # Tight check vs a reference using the same bf16 MXU-operand quantization.
    ref_bf16 = reference_forward_bf16(text_f, img_f, w1, b1, w2, b2)
    assert jnp.allclose(out, ref_bf16, atol=1e-4, rtol=1e-3), "mismatch vs bf16 reference"

    # Loose sanity check vs the pure-f32 PyTorch-equivalent math.
    ref_f32 = reference_forward_f32(text_f, img_f, w1, b1, w2, b2)
    assert jnp.allclose(out, ref_f32, atol=5e-2, rtol=5e-2), "mismatch vs f32 reference"

    print("KERNEL_OK")
</pallas_src>

<mosaic_0001>
module attributes {stable_mosaic.version = 11 : i64} {
  func.func @classifier_kernel(%arg0: i32, %arg1: memref<8x16xf32, #tpu.memory_space<vmem>>, %arg2: memref<8x16xf32, #tpu.memory_space<vmem>>, %arg3: memref<16x32xbf16, #tpu.memory_space<vmem>>, %arg4: memref<16x32xbf16, #tpu.memory_space<vmem>>, %arg5: memref<1x32xf32, #tpu.memory_space<vmem>>, %arg6: memref<32x16xbf16, #tpu.memory_space<vmem>>, %arg7: memref<1x16xf32, #tpu.memory_space<vmem>>, %arg8: memref<8x16xf32, #tpu.memory_space<vmem>>) attributes {dimension_semantics = [#tpu.dimension_semantics<parallel>], iteration_bounds = array<i64: 1>, scalar_prefetch = 0 : i64, scratch_operands = 0 : i64, tpu.core_type = #tpu.core_type<tc>, window_params = [{transform_indices = @transform_0, window_bounds = array<i64: 8, 16>}, {transform_indices = @transform_1, window_bounds = array<i64: 8, 16>}, {pipeline_mode = #tpu.pipeline_mode<synchronous>, transform_indices = @transform_2, window_bounds = array<i64: 16, 32>}, {pipeline_mode = #tpu.pipeline_mode<synchronous>, transform_indices = @transform_3, window_bounds = array<i64: 16, 32>}, {pipeline_mode = #tpu.pipeline_mode<synchronous>, transform_indices = @transform_4, window_bounds = array<i64: 1, 32>}, {pipeline_mode = #tpu.pipeline_mode<synchronous>, transform_indices = @transform_5, window_bounds = array<i64: 32, 16>}, {pipeline_mode = #tpu.pipeline_mode<synchronous>, transform_indices = @transform_6, window_bounds = array<i64: 1, 16>}, {transform_indices = @transform_7, window_bounds = array<i64: 8, 16>}]} {
    %c0 = arith.constant 0 : index
    %c0_0 = arith.constant 0 : index
    %0 = vector.load %arg1[%c0, %c0_0] : memref<8x16xf32, #tpu.memory_space<vmem>>, vector<8x16xf32>
    %1 = arith.truncf %0 : vector<8x16xf32> to vector<8x16xbf16>
    %c0_1 = arith.constant 0 : index
    %c0_2 = arith.constant 0 : index
    %2 = vector.load %arg2[%c0_1, %c0_2] : memref<8x16xf32, #tpu.memory_space<vmem>>, vector<8x16xf32>
    %3 = arith.truncf %2 : vector<8x16xf32> to vector<8x16xbf16>
    %c0_3 = arith.constant 0 : index
    %c0_4 = arith.constant 0 : index
    %4 = vector.load %arg3[%c0_3, %c0_4] : memref<16x32xbf16, #tpu.memory_space<vmem>>, vector<16x32xbf16>
    %cst = arith.constant dense<0.000000e+00> : vector<8x32xf32>
    %5 = tpu.matmul %1, %4, %cst {dimension_numbers = #tpu.dot_dimension_numbers<[1], [0], [0], [1], [0, 0, 1, 1], [], []>} : vector<8x16xbf16>, vector<16x32xbf16>, vector<8x32xf32> -> vector<8x32xf32>
    %c0_5 = arith.constant 0 : index
    %c0_6 = arith.constant 0 : index
    %6 = vector.load %arg4[%c0_5, %c0_6] : memref<16x32xbf16, #tpu.memory_space<vmem>>, vector<16x32xbf16>
    %cst_7 = arith.constant dense<0.000000e+00> : vector<8x32xf32>
    %7 = tpu.matmul %3, %6, %cst_7 {dimension_numbers = #tpu.dot_dimension_numbers<[1], [0], [0], [1], [0, 0, 1, 1], [], []>} : vector<8x16xbf16>, vector<16x32xbf16>, vector<8x32xf32> -> vector<8x32xf32>
    %8 = arith.addf %5, %7 : vector<8x32xf32>
    %c0_8 = arith.constant 0 : index
    %c0_9 = arith.constant 0 : index
    %9 = vector.load %arg5[%c0_8, %c0_9] : memref<1x32xf32, #tpu.memory_space<vmem>>, vector<1x32xf32>
    %10 = vector.broadcast %9 : vector<1x32xf32> to vector<8x32xf32>
    %11 = arith.addf %8, %10 : vector<8x32xf32>
    %cst_10 = arith.constant 0.000000e+00 : f32
    %12 = vector.broadcast %cst_10 : f32 to vector<8x32xf32>
    %13 = arith.maximumf %11, %12 : vector<8x32xf32>
    %14 = arith.truncf %13 : vector<8x32xf32> to vector<8x32xbf16>
    %c0_11 = arith.constant 0 : index
    %c0_12 = arith.constant 0 : index
    %15 = vector.load %arg6[%c0_11, %c0_12] : memref<32x16xbf16, #tpu.memory_space<vmem>>, vector<32x16xbf16>
    %cst_13 = arith.constant dense<0.000000e+00> : vector<8x16xf32>
    %16 = tpu.matmul %14, %15, %cst_13 {dimension_numbers = #tpu.dot_dimension_numbers<[1], [0], [0], [1], [0, 0, 1, 1], [], []>} : vector<8x32xbf16>, vector<32x16xbf16>, vector<8x16xf32> -> vector<8x16xf32>
    %c0_14 = arith.constant 0 : index
    %c0_15 = arith.constant 0 : index
    %17 = vector.load %arg7[%c0_14, %c0_15] : memref<1x16xf32, #tpu.memory_space<vmem>>, vector<1x16xf32>
    %18 = vector.broadcast %17 : vector<1x16xf32> to vector<8x16xf32>
    %19 = arith.addf %16, %18 : vector<8x16xf32>
    %c0_16 = arith.constant 0 : index
    %c0_17 = arith.constant 0 : index
    %20 = vector.load %arg8[%c0_16, %c0_17] : memref<8x16xf32, #tpu.memory_space<vmem>>, vector<8x16xf32>
    tpu.vector_store %arg8[%c0_16, %c0_17], %19 {strides = array<i32>} : memref<8x16xf32, #tpu.memory_space<vmem>>, vector<8x16xf32>,
    return
  }
  func.func @transform_0(%arg0: i32) -> (i32, i32) {
    %c0_i32 = arith.constant 0 : i32
    %c0_i32_0 = arith.constant 0 : i32
    return %arg0, %c0_i32 : i32, i32
  }
  func.func @transform_1(%arg0: i32) -> (i32, i32) {
    %c0_i32 = arith.constant 0 : i32
    %c0_i32_0 = arith.constant 0 : i32
    return %arg0, %c0_i32 : i32, i32
  }
  func.func @transform_2(%arg0: i32) -> (i32, i32) {
    %c0_i32 = arith.constant 0 : i32
    %c0_i32_0 = arith.constant 0 : i32
    %c0_i32_1 = arith.constant 0 : i32
    return %c0_i32, %c0_i32_0 : i32, i32
  }
  func.func @transform_3(%arg0: i32) -> (i32, i32) {
    %c0_i32 = arith.constant 0 : i32
    %c0_i32_0 = arith.constant 0 : i32
    %c0_i32_1 = arith.constant 0 : i32
    return %c0_i32, %c0_i32_0 : i32, i32
  }
  func.func @transform_4(%arg0: i32) -> (i32, i32) {
    %c0_i32 = arith.constant 0 : i32
    %c0_i32_0 = arith.constant 0 : i32
    %c0_i32_1 = arith.constant 0 : i32
    return %c0_i32, %c0_i32_0 : i32, i32
  }
  func.func @transform_5(%arg0: i32) -> (i32, i32) {
    %c0_i32 = arith.constant 0 : i32
    %c0_i32_0 = arith.constant 0 : i32
    %c0_i32_1 = arith.constant 0 : i32
    return %c0_i32, %c0_i32_0 : i32, i32
  }
  func.func @transform_6(%arg0: i32) -> (i32, i32) {
    %c0_i32 = arith.constant 0 : i32
    %c0_i32_0 = arith.constant 0 : i32
    %c0_i32_1 = arith.constant 0 : i32
    return %c0_i32, %c0_i32_0 : i32, i32
  }
  func.func @transform_7(%arg0: i32) -> (i32, i32) {
    %c0_i32 = arith.constant 0 : i32
    %c0_i32_0 = arith.constant 0 : i32
    return %arg0, %c0_i32 : i32, i32
  }
}

</mosaic_0001>

<bundles_post_ra>
// kernel: tpu_custom_call.1
= control target key start
LH: loop header
LB: loop body
LE: loop exit
PB: predicated region body
PF: predicated region fallthrough
CT: control target
= control target key end

     0   :  { %12 = vsyncpa [#allocation3], 0  ;;  %v298_v1 = vmov 0.0   ;;  %vm42_vm0 = vcmask 130048   ;;  %vm299_vm1 = vmmov 0   ;;  %vm168_vm2 = vcmask 261120   ;;  %s382_s0 = inlined_call_operand.vmem [shape: f32[2,16], index: 0, kind: input, shape index: {}]   ;;  %s383_s1 = inlined_call_operand.vmem [shape: f32[2,16], index: 1, kind: input, shape index: {}]   ;;  %s384_s2 = inlined_call_operand.vmem [shape: bf16[16,32], index: 2, kind: input, shape index: {}]   ;;  %s385_s3 = inlined_call_operand.vmem [shape: bf16[16,32], index: 3, kind: input, shape index: {}]   ;;  %s386_s4 = inlined_call_operand.vmem [shape: f32[1,32], index: 4, kind: input, shape index: {}]   ;;  %s387_s5 = inlined_call_operand.vmem [shape: bf16[32,16], index: 5, kind: input, shape index: {}]   ;;  %s388_s6 = inlined_call_operand.vmem [shape: f32[1,16], index: 6, kind: input, shape index: {}]   ;;  %s389_s7 = inlined_call_operand.hbm [shape: f32[2,16], index: 7, kind: output, shape index: {}]  }
   0x1   :  { %v270_v0 = vld [vmem:[%s385_s3] sm:$0xff]   ;;  %245 = vmatprep.subr.bf16.mxu0 %v298_v1  ;;  %251 = vmatprep.subr.bf16.mxu1 %v298_v1  ;;  %v273_v8 = vld [vmem:[%s387_s5 + $0x8] sm:$0xff]  }
   0x2   :  { %246 = vmatpush3.bf16.msra.mxu0 %v270_v0  ;;  %v271_v2 = vld [vmem:[%s384_s2] sm:$0xff]   ;;  %247 = vmatprep.mubr.msk.bf16.mxu0 %vm299_vm1, %v298_v1 }
   0x3   :  { %v30_v3 = vld [vmem:[%s383_s1] sm:$0xff]  ;;  %253 = vmatprep.mubr.msk.bf16.mxu1 %vm299_vm1, %v298_v1  ;;  %252 = vmatpush3.bf16.msra.mxu1 %v271_v2 }
   0x4   :  { %v28_v4 = vld [vmem:[%s382_s0] sm:$0xff]  ;;  %v31_v5 = vpack.c.bf16 %v30_v3, %v30_v3  ;;  %257 = vmatprep.subr.bf16.mxu0 %v298_v1 }
   0x5   :  { %v29_v6 = vpack.c.bf16 %v28_v4, %v28_v4  ;;  %v272_v7 = vld [vmem:[%s387_s5] sm:$0xff]  }
   0x6   :  { %248 = vmatmul.mubr.msk.bf16.vlgmr.msra.gmra.mrb[0].mxu0 %vm42_vm0, %v31_v5  ;;  %v233_v12 = vld [vmem:[%s386_s4] ss:$0 sm:$0xff] }
   0x7   :  { %261 = vmatprep.mubr.msk.bf16.mxu0 %vm299_vm1, %v298_v1  ;;  %254 = vmatmul.mubr.msk.bf16.vlgmr.msra.gmra.mrb[0].mxu1 %vm42_vm0, %v29_v6  ;;  %v234_v22 = vld [vmem:[%s388_s6] ss:$0 sm:$0xff] }
   0x8   :  { %258 = vmatpush3.bf16.msra.mxu0 %v272_v7 }
   0x9   :  { %259 = vmatprep.subr.bf16.mxu0 %v298_v1 }
   0xc   :  { %260 = vmatpush3.bf16.msra.mxu0 %v273_v8 }
  0xd9   :  { %v80_v9 = vpop.f32.mrb[0].mxu0 }
  0xda   :  { %v249_v10 = vpop.f32.mrb[1].mxu0  ;;  %v129_v11 = vpop.f32.mrb[0].mxu1 }
  0xdb   :  { %v83_v13 = vpop.f32.mrb[2].mxu0  ;;  %v130_v14 = vadd.f32 %v129_v11, %v80_v9  ;;  %v255_v15 = vpop.f32.mrb[1].mxu1 }
  0xdc   :  { %v250_v16 = vpop.f32.mrb[3].mxu0  ;;  %v132_v17 = vpop.f32.mrb[2].mxu1 }
  0xdd   :  { %v142_v18 = vadd.f32 %v233_v12, %v130_v14  ;;  %v256_v19 = vpop.f32.mrb[3].mxu1 }
  0xdf   :  { %v143_v20 = vmax.f32 %v142_v18, 0.0 }
  0xe1   :  { %v144_v21 = vpack.c.bf16 %v143_v20, %v143_v20 }
  0xe3   :  { %262 = vmatmul.mubr.msk.bf16.vlgmr.msra.gmra.mrb[4].mxu0 %vm168_vm2, %v144_v21 }
 0x1b6   :  { %v206_v23 = vpop.f32.mrb[4].mxu0 }
 0x1b7   :  { %v207_v24 = vadd.f32 %v234_v22, %v206_v23  ;;  %v263_v25 = vpop.f32.mrb[5].mxu0 }
 0x1b8   :  { %v209_v26 = vpop.f32.mrb[6].mxu0 }
 0x1b9   :  { %212 = vst.msk [vmem:[#allocation2] sm:$0xff] %vm42_vm0, %v207_v24  ;;  %v264_v27 = vpop.f32.mrb[7].mxu0 }
 0x1ba   :  { %217 = vsyncadd [#allocation3], 96  ;;  %s300_s4 = smov [#allocation2]  }
 0x1bb   :  { %s218_s12 = sshll.u32 %s300_s4, 4  ;;  %s219_s12 = int_to_ptr.vmem [resolvable:$true] %s218_s12 }
 0x1bc   :  { %s274_s13 = scalar_lea.vmem %s219_s12, 32  ;;  %s278_s14 = scalar_lea.vmem %s219_s12, 128 }
 0x1bd   :  { %p275_p0 = scmp.ne.s32.totalorder %s219_s12, %s274_s13  ;;  %p279_p1 = scmp.lt.s32.totalorder %s219_s12, %s219_s12 }
 0x1be   :  { %p280_p2 = scmp.lt.s32.totalorder %s278_s14, %s274_s13 }
 0x1c0   :  { %p281_p3 = por %p280_p2, %p279_p1 }
 0x1c2   :  { %p282_p4 = pnand %p281_p3, %p275_p0 }
 0x1c4   :  { %285 = shalt.err (!%p282_p4)
}
 0x1c5   :  { %s286_s16 = scalar_lea.hbm %s389_s7, 32 }
 0x1c6   :  { %p287_p5 = scmp.ne.s32.totalorder %s389_s7, %s286_s16  ;;  %p290_p6 = scmp.lt.u32.totalorder %s286_s16, %s389_s7 }
 0x1c8   :  { %p292_p7 = pnand %p290_p6, %p287_p5 }
 0x1ca   :  { %295 = shalt.err (!%p292_p7)
}
 0x1cb   :  { %s301_s21 = smov 32   ;;  %s302_s22 = smov 2  }
 0x1cc   :  { %224 = dma.vmem_to_hbm [thread:$0]  %s219_s12, 32, %s389_s7, [#allocation3], %s301_s21, %s301_s21, %s302_s22  }
 0x1cd   :  { %296 = dma.done.wait [#allocation3], 128  }
 0x1ce   :  { %297 = vsyncadd [#allocation3], 4294967168 }
 0x1cf   :  { %228 = vsyncpa [#allocation3], 1 }

</bundles_post_ra>
